<compile_context>
chip_gen: v7x
topology: tpu7x:2x2x1
jax: 0.10.0
libtpu: 0.0.40
codegen_flags: <defaults>
</compile_context>

<pallas_src>
import math

import jax
import jax.numpy as jnp
from jax import lax
from jax.experimental import pallas as pl
from jax.experimental.pallas import tpu as pltpu

BN_EPS = 1e-5
LANES = 128


def _eca_kernel_size(channels, gamma=2, beta=1):
    k = int(abs(math.log2(channels) / gamma + beta / gamma))
    return k if k % 2 else k + 1


def _round_up(x, m):
    return ((x + m - 1) // m) * m


def _make_kernel(*, B, HW, Cin, Cout, KH, KW, Wp, Nt):
    """Fused conv -> BN(batch stats) -> ECA -> ReLU, transposed layout."""

    def kernel(xg_ref, w_ref, cp_ref, st_ref, out_ref):
        # ---- Conv2d: in-kernel im2col as KH*KW shifted-tap MXU matmuls ------
        # xg is the channel-major, zero-padded, flattened spatial grid with an
        # extra zero margin so every tap is a constant lane offset.
        xg = xg_ref[...]                                        # (Cin, Nt + 2*margin)
        conv = jnp.zeros((Cout, Nt), jnp.float32)
        for kh in range(KH):
            for kw in range(KW):
                tap = kh * KW + kw
                w_tap = w_ref[:, tap * Cin:(tap + 1) * Cin]     # (Cout, Cin)
                x_tap = xg[:, kh * Wp + kw: kh * Wp + kw + Nt]  # (Cin, Nt)
                conv = conv + jnp.dot(w_tap, x_tap,
                                      preferred_element_type=jnp.float32)
        # NOTE: conv bias intentionally omitted -- a per-channel constant shifts
        # the batch mean identically and cancels under batch-stat BatchNorm.

        # ---- BN stats + per-image GAP with ONE matmul on the MXU ------------
        # st rows 0..B-1: per-image GAP weights (1/HW on valid pixels of image b)
        # st row  B     : global mean weights   (1/(B*HW) on all valid pixels)
        st = st_ref[...]                                        # (B+1, Nt)
        c2 = jnp.concatenate([conv, conv * conv], axis=0)       # (2*Cout, Nt)
        mom = lax.dot_general(c2, st, (((1,), (1,)), ((), ())),
                              preferred_element_type=jnp.float32)  # (2*Cout, B+1)
        gap_c = mom[:Cout, :B]                                  # per-image GAP of conv
        mean = mom[:Cout, B:B + 1]                              # (Cout, 1)
        ex2 = mom[Cout:, B:B + 1]                               # (Cout, 1)
        var = ex2 - mean * mean                                 # biased batch variance

        # ---- fold BatchNorm into a per-channel scale/shift -------------------
        gamma = cp_ref[:, 0:1]
        beta = cp_ref[:, 1:2]
        a = gamma * lax.rsqrt(var + BN_EPS)                     # (Cout, 1)
        b = beta - mean * a                                     # (Cout, 1)

        # ---- ECA: banded channel conv on the per-image GAP of bn -------------
        gap_bn = a * gap_c + b                                  # GAP is linear in conv
        band_t = cp_ref[:, 2:2 + Cout]                          # (Cout, Cout) Toeplitz^T
        z = jnp.dot(band_t, gap_bn, preferred_element_type=jnp.float32)
        att = 1.0 / (1.0 + jnp.exp(-z))                         # sigmoid, (Cout, B)

        # ---- fold attention into scale/shift; expand over lanes on the MXU ---
        sc_sh = jnp.concatenate([a * att, b * att], axis=0) * float(HW)  # (2*Cout, B)
        full = jnp.dot(sc_sh, st[:B, :],
                       preferred_element_type=jnp.float32)      # (2*Cout, Nt)

        # ---- single fused apply pass: mul + add + ReLU, lane-dense store -----
        out_ref[...] = jnp.maximum(full[:Cout, :] * conv + full[Cout:, :], 0.0)

    return kernel


def eca_block_forward(x_nchw, w_conv, b_conv, bn_gamma, bn_beta, w_eca):
    """x_nchw: (B, Cin, H, W). Returns (B, Cout, H, W)."""
    del b_conv  # cancels exactly under training-mode (batch-stat) BatchNorm
    B, Cin, H, W = x_nchw.shape
    Cout, _, KH, KW = w_conv.shape
    p = (KH - 1) // 2
    Hp, Wp = H + 2 * p, W + 2 * p
    Ng = B * Hp * Wp                       # real columns on the flat padded grid
    Nt = _round_up(Ng, LANES)              # lane-dense width (extra cols are garbage)
    margin = p * Wp + p                    # max tap offset on the flat grid
    f32 = jnp.float32

    # --- glue: NCHW -> channel-major flattened padded grid (+ zero margins) ---
    x = jnp.transpose(x_nchw, (0, 2, 3, 1)).astype(f32)            # NHWC
    x_pad = jnp.pad(x, ((0, 0), (p, p), (p, p), (0, 0)))           # (B, Hp, Wp, Cin)
    xf = jnp.transpose(x_pad, (3, 0, 1, 2)).reshape(Cin, Ng)       # (Cin, Ng)
    xg = jnp.pad(xf, ((0, 0), (margin, (Nt - Ng) + margin)))       # (Cin, Nt+2*margin)

    # conv weight (Cout, Cin, KH, KW) -> tap-major (Cout, KH*KW*Cin)
    w2 = jnp.transpose(w_conv, (0, 2, 3, 1)).reshape(Cout, KH * KW * Cin).astype(f32)

    # ECA conv1d weight -> transposed banded channel-mixing matrix:
    # att = band_t @ gap, band_t[c_out, c_in] = w1[c_in - c_out + epad]
    w1 = w_eca.reshape(-1).astype(f32)
    k_eca = w1.shape[0]
    ep = (k_eca - 1) // 2
    ci = jnp.arange(Cout)
    idx = ci[None, :] - ci[:, None] + ep
    band_t = jnp.where((idx >= 0) & (idx < k_eca),
                       w1[jnp.clip(idx, 0, k_eca - 1)], 0.0).astype(f32)

    # pack small per-channel operands into one array: [gamma | beta | band_t]
    cparams = jnp.concatenate([bn_gamma.astype(f32)[:, None],
                               bn_beta.astype(f32)[:, None],
                               band_t], axis=1)                    # (Cout, 2+Cout)

    # averaging matrix: rows 0..B-1 per-image GAP weights, row B global mean
    hp = jnp.arange(Hp)
    wpv = jnp.arange(Wp)
    valid2d = (((hp >= p) & (hp < p + H))[:, None] &
               ((wpv >= p) & (wpv < p + W))[None, :])              # (Hp, Wp)
    valid = jnp.tile(valid2d.reshape(-1), B).astype(f32)           # (Ng,)
    img_onehot = (jnp.arange(Ng) // (Hp * Wp) ==
                  jnp.arange(B)[:, None]).astype(f32)              # (B, Ng)
    st = jnp.concatenate([img_onehot * valid[None, :] / (H * W),
                          (valid / (B * H * W))[None, :]], axis=0)  # (B+1, Ng)
    st = jnp.pad(st, ((0, 0), (0, Nt - Ng)))                        # (B+1, Nt)

    kernel = _make_kernel(B=B, HW=H * W, Cin=Cin, Cout=Cout,
                          KH=KH, KW=KW, Wp=Wp, Nt=Nt)
    args = (xg, w2, cparams, st)
    out2d = pl.pallas_call(
        kernel,
        out_shape=jax.ShapeDtypeStruct((Cout, Nt), f32),
        grid=(1,),
        in_specs=[pl.BlockSpec(a.shape, lambda i: (0, 0)) for a in args],
        out_specs=pl.BlockSpec((Cout, Nt), lambda i: (0, 0)),
        compiler_params=pltpu.CompilerParams(
            dimension_semantics=("arbitrary",)),
    )(*args)

    # --- glue: padded flat grid -> NCHW ---------------------------------------
    y = out2d[:, :Ng].reshape(Cout, B, Hp, Wp)[:, :, p:p + H, p:p + W]
    return jnp.transpose(y, (1, 0, 2, 3))


# ----- pure-JAX reference for correctness check -------------------------------
def reference_forward(x_nchw, w_conv, b_conv, bn_gamma, bn_beta, w_eca):
    y = lax.conv_general_dilated(
        x_nchw, w_conv, window_strides=(1, 1), padding=((1, 1), (1, 1)),
        dimension_numbers=("NCHW", "OIHW", "NCHW"))
    y = y + b_conv[None, :, None, None]
    mean = y.mean(axis=(0, 2, 3), keepdims=True)
    var = ((y - mean) ** 2).mean(axis=(0, 2, 3), keepdims=True)
    y = (y - mean) / jnp.sqrt(var + BN_EPS)
    y = y * bn_gamma[None, :, None, None] + bn_beta[None, :, None, None]
    gap = y.mean(axis=(2, 3))                                  # (B, C)
    w1 = w_eca.reshape(-1)
    k = w1.shape[0]
    p = (k - 1) // 2
    gp = jnp.pad(gap, ((0, 0), (p, p)))
    att = jnp.stack([(gp[:, c:c + k] * w1).sum(-1)
                     for c in range(gap.shape[1])], axis=-1)
    att = 1.0 / (1.0 + jnp.exp(-att))
    return jnp.maximum(y * att[:, :, None, None], 0.0)


if __name__ == "__main__":
    B, Cin, Cout, H, W = 2, 4, 8, 16, 16

    key = jax.random.PRNGKey(0)
    k1, k2, k3, k4, k5, k6 = jax.random.split(key, 6)
    x = jax.random.normal(k1, (B, Cin, H, W), jnp.float32)

    # deterministic synthetic parameters (shapes per the module's __init__)
    w_conv = 0.2 * jax.random.normal(k2, (Cout, Cin, 3, 3), jnp.float32)
    b_conv = 0.1 * jax.random.normal(k3, (Cout,), jnp.float32)
    bn_gamma = 1.0 + 0.1 * jax.random.normal(k4, (Cout,), jnp.float32)
    bn_beta = 0.1 * jax.random.normal(k5, (Cout,), jnp.float32)
    k_eca = _eca_kernel_size(Cout)                        # = 3 for Cout=8
    xavier_std = math.sqrt(2.0 / (k_eca + k_eca))         # xavier_normal_ on (1,1,k)
    w_eca = xavier_std * jax.random.normal(k6, (1, 1, k_eca), jnp.float32)

    out = eca_block_forward(x, w_conv, b_conv, bn_gamma, bn_beta, w_eca)
    out = jax.block_until_ready(out)

    ref = reference_forward(x, w_conv, b_conv, bn_gamma, bn_beta, w_eca)
    assert out.shape == (B, Cout, H, W)
    assert jnp.allclose(out, ref, atol=2e-3, rtol=2e-3), \
        float(jnp.max(jnp.abs(out - ref)))
    print("KERNEL_OK")
</pallas_src>

<mosaic_0001>
module attributes {stable_mosaic.version = 11 : i64} {
  func.func @kernel(%arg0: i32, %arg1: memref<4x806xf32, #tpu.memory_space<vmem>>, %arg2: memref<8x36xf32, #tpu.memory_space<vmem>>, %arg3: memref<8x10xf32, #tpu.memory_space<vmem>>, %arg4: memref<3x768xf32, #tpu.memory_space<vmem>>, %arg5: memref<8x768xf32, #tpu.memory_space<vmem>>) attributes {dimension_semantics = [#tpu.dimension_semantics<arbitrary>], iteration_bounds = array<i64: 1>, scalar_prefetch = 0 : i64, scratch_operands = 0 : i64, tpu.core_type = #tpu.core_type<tc>, window_params = [{pipeline_mode = #tpu.pipeline_mode<synchronous>, transform_indices = @transform_0, window_bounds = array<i64: 4, 806>}, {pipeline_mode = #tpu.pipeline_mode<synchronous>, transform_indices = @transform_1, window_bounds = array<i64: 8, 36>}, {pipeline_mode = #tpu.pipeline_mode<synchronous>, transform_indices = @transform_2, window_bounds = array<i64: 8, 10>}, {pipeline_mode = #tpu.pipeline_mode<synchronous>, transform_indices = @transform_3, window_bounds = array<i64: 3, 768>}, {pipeline_mode = #tpu.pipeline_mode<synchronous>, transform_indices = @transform_4, window_bounds = array<i64: 8, 768>}]} {
    %c0 = arith.constant 0 : index
    %c0_0 = arith.constant 0 : index
    %0 = vector.load %arg1[%c0, %c0_0] : memref<4x806xf32, #tpu.memory_space<vmem>>, vector<4x806xf32>
    %cst = arith.constant 0.000000e+00 : f32
    %1 = vector.broadcast %cst : f32 to vector<8x768xf32>
    %c0_1 = arith.constant 0 : index
    %c0_2 = arith.constant 0 : index
    %2 = vector.load %arg2[%c0_1, %c0_2] : memref<8x36xf32, #tpu.memory_space<vmem>>, vector<8x4xf32>
    %3 = vector.extract_strided_slice %0 {offsets = [0, 0], sizes = [4, 768], strides = [1, 1]} : vector<4x806xf32> to vector<4x768xf32>
    %cst_3 = arith.constant dense<0.000000e+00> : vector<8x768xf32>
    %4 = tpu.matmul %2, %3, %cst_3 {dimension_numbers = #tpu.dot_dimension_numbers<[1], [0], [0], [1], [0, 0, 1, 1], [], []>} : vector<8x4xf32>, vector<4x768xf32>, vector<8x768xf32> -> vector<8x768xf32>
    %5 = arith.addf %1, %4 : vector<8x768xf32>
    %c0_4 = arith.constant 0 : index
    %c4 = arith.constant 4 : index
    %6 = vector.load %arg2[%c0_4, %c4] : memref<8x36xf32, #tpu.memory_space<vmem>>, vector<8x4xf32>
    %7 = vector.extract_strided_slice %0 {offsets = [0, 1], sizes = [4, 768], strides = [1, 1]} : vector<4x806xf32> to vector<4x768xf32>
    %cst_5 = arith.constant dense<0.000000e+00> : vector<8x768xf32>
    %8 = tpu.matmul %6, %7, %cst_5 {dimension_numbers = #tpu.dot_dimension_numbers<[1], [0], [0], [1], [0, 0, 1, 1], [], []>} : vector<8x4xf32>, vector<4x768xf32>, vector<8x768xf32> -> vector<8x768xf32>
    %9 = arith.addf %5, %8 : vector<8x768xf32>
    %c0_6 = arith.constant 0 : index
    %c8 = arith.constant 8 : index
    %10 = vector.load %arg2[%c0_6, %c8] : memref<8x36xf32, #tpu.memory_space<vmem>>, vector<8x4xf32>
    %11 = vector.extract_strided_slice %0 {offsets = [0, 2], sizes = [4, 768], strides = [1, 1]} : vector<4x806xf32> to vector<4x768xf32>
    %cst_7 = arith.constant dense<0.000000e+00> : vector<8x768xf32>
    %12 = tpu.matmul %10, %11, %cst_7 {dimension_numbers = #tpu.dot_dimension_numbers<[1], [0], [0], [1], [0, 0, 1, 1], [], []>} : vector<8x4xf32>, vector<4x768xf32>, vector<8x768xf32> -> vector<8x768xf32>
    %13 = arith.addf %9, %12 : vector<8x768xf32>
    %c0_8 = arith.constant 0 : index
    %c12 = arith.constant 12 : index
    %14 = vector.load %arg2[%c0_8, %c12] : memref<8x36xf32, #tpu.memory_space<vmem>>, vector<8x4xf32>
    %15 = vector.extract_strided_slice %0 {offsets = [0, 18], sizes = [4, 768], strides = [1, 1]} : vector<4x806xf32> to vector<4x768xf32>
    %cst_9 = arith.constant dense<0.000000e+00> : vector<8x768xf32>
    %16 = tpu.matmul %14, %15, %cst_9 {dimension_numbers = #tpu.dot_dimension_numbers<[1], [0], [0], [1], [0, 0, 1, 1], [], []>} : vector<8x4xf32>, vector<4x768xf32>, vector<8x768xf32> -> vector<8x768xf32>
    %17 = arith.addf %13, %16 : vector<8x768xf32>
    %c0_10 = arith.constant 0 : index
    %c16 = arith.constant 16 : index
    %18 = vector.load %arg2[%c0_10, %c16] : memref<8x36xf32, #tpu.memory_space<vmem>>, vector<8x4xf32>
    %19 = vector.extract_strided_slice %0 {offsets = [0, 19], sizes = [4, 768], strides = [1, 1]} : vector<4x806xf32> to vector<4x768xf32>
    %cst_11 = arith.constant dense<0.000000e+00> : vector<8x768xf32>
    %20 = tpu.matmul %18, %19, %cst_11 {dimension_numbers = #tpu.dot_dimension_numbers<[1], [0], [0], [1], [0, 0, 1, 1], [], []>} : vector<8x4xf32>, vector<4x768xf32>, vector<8x768xf32> -> vector<8x768xf32>
    %21 = arith.addf %17, %20 : vector<8x768xf32>
    %c0_12 = arith.constant 0 : index
    %c20 = arith.constant 20 : index
    %22 = vector.load %arg2[%c0_12, %c20] : memref<8x36xf32, #tpu.memory_space<vmem>>, vector<8x4xf32>
    %23 = vector.extract_strided_slice %0 {offsets = [0, 20], sizes = [4, 768], strides = [1, 1]} : vector<4x806xf32> to vector<4x768xf32>
    %cst_13 = arith.constant dense<0.000000e+00> : vector<8x768xf32>
    %24 = tpu.matmul %22, %23, %cst_13 {dimension_numbers = #tpu.dot_dimension_numbers<[1], [0], [0], [1], [0, 0, 1, 1], [], []>} : vector<8x4xf32>, vector<4x768xf32>, vector<8x768xf32> -> vector<8x768xf32>
    %25 = arith.addf %21, %24 : vector<8x768xf32>
    %c0_14 = arith.constant 0 : index
    %c24 = arith.constant 24 : index
    %26 = vector.load %arg2[%c0_14, %c24] : memref<8x36xf32, #tpu.memory_space<vmem>>, vector<8x4xf32>
    %27 = vector.extract_strided_slice %0 {offsets = [0, 36], sizes = [4, 768], strides = [1, 1]} : vector<4x806xf32> to vector<4x768xf32>
    %cst_15 = arith.constant dense<0.000000e+00> : vector<8x768xf32>
    %28 = tpu.matmul %26, %27, %cst_15 {dimension_numbers = #tpu.dot_dimension_numbers<[1], [0], [0], [1], [0, 0, 1, 1], [], []>} : vector<8x4xf32>, vector<4x768xf32>, vector<8x768xf32> -> vector<8x768xf32>
    %29 = arith.addf %25, %28 : vector<8x768xf32>
    %c0_16 = arith.constant 0 : index
    %c28 = arith.constant 28 : index
    %30 = vector.load %arg2[%c0_16, %c28] : memref<8x36xf32, #tpu.memory_space<vmem>>, vector<8x4xf32>
    %31 = vector.extract_strided_slice %0 {offsets = [0, 37], sizes = [4, 768], strides = [1, 1]} : vector<4x806xf32> to vector<4x768xf32>
    %cst_17 = arith.constant dense<0.000000e+00> : vector<8x768xf32>
    %32 = tpu.matmul %30, %31, %cst_17 {dimension_numbers = #tpu.dot_dimension_numbers<[1], [0], [0], [1], [0, 0, 1, 1], [], []>} : vector<8x4xf32>, vector<4x768xf32>, vector<8x768xf32> -> vector<8x768xf32>
    %33 = arith.addf %29, %32 : vector<8x768xf32>
    %c0_18 = arith.constant 0 : index
    %c32 = arith.constant 32 : index
    %34 = vector.load %arg2[%c0_18, %c32] : memref<8x36xf32, #tpu.memory_space<vmem>>, vector<8x4xf32>
    %35 = vector.extract_strided_slice %0 {offsets = [0, 38], sizes = [4, 768], strides = [1, 1]} : vector<4x806xf32> to vector<4x768xf32>
    %cst_19 = arith.constant dense<0.000000e+00> : vector<8x768xf32>
    %36 = tpu.matmul %34, %35, %cst_19 {dimension_numbers = #tpu.dot_dimension_numbers<[1], [0], [0], [1], [0, 0, 1, 1], [], []>} : vector<8x4xf32>, vector<4x768xf32>, vector<8x768xf32> -> vector<8x768xf32>
    %37 = arith.addf %33, %36 : vector<8x768xf32>
    %c0_20 = arith.constant 0 : index
    %c0_21 = arith.constant 0 : index
    %38 = vector.load %arg4[%c0_20, %c0_21] : memref<3x768xf32, #tpu.memory_space<vmem>>, vector<3x768xf32>
    %39 = arith.mulf %37, %37 : vector<8x768xf32>
    %40 = tpu.concatenate %37, %39 in 0 : vector<8x768xf32>, vector<8x768xf32> -> vector<16x768xf32>
    %cst_22 = arith.constant dense<0.000000e+00> : vector<16x3xf32>
    %41 = tpu.matmul %40, %38, %cst_22 {dimension_numbers = #tpu.dot_dimension_numbers<[1], [1], [0], [0], [0, 0, 1, 0], [], []>} : vector<16x768xf32>, vector<3x768xf32>, vector<16x3xf32> -> vector<16x3xf32>
    %42 = vector.extract_strided_slice %41 {offsets = [0, 0], sizes = [8, 2], strides = [1, 1]} : vector<16x3xf32> to vector<8x2xf32>
    %43 = vector.extract_strided_slice %41 {offsets = [0, 2], sizes = [8, 1], strides = [1, 1]} : vector<16x3xf32> to vector<8x1xf32>
    %44 = vector.extract_strided_slice %41 {offsets = [8, 2], sizes = [8, 1], strides = [1, 1]} : vector<16x3xf32> to vector<8x1xf32>
    %45 = arith.mulf %43, %43 : vector<8x1xf32>
    %46 = arith.subf %44, %45 : vector<8x1xf32>
    %c0_23 = arith.constant 0 : index
    %c0_24 = arith.constant 0 : index
    %47 = vector.load %arg3[%c0_23, %c0_24] : memref<8x10xf32, #tpu.memory_space<vmem>>, vector<8x1xf32>
    %c0_25 = arith.constant 0 : index
    %c1 = arith.constant 1 : index
    %48 = vector.load %arg3[%c0_25, %c1] : memref<8x10xf32, #tpu.memory_space<vmem>>, vector<8x1xf32>
    %cst_26 = arith.constant 9.99999974E-6 : f32
    %49 = vector.broadcast %cst_26 : f32 to vector<8x1xf32>
    %50 = arith.addf %46, %49 : vector<8x1xf32>
    %51 = math.rsqrt %50 : vector<8x1xf32>
    %52 = arith.mulf %47, %51 : vector<8x1xf32>
    %53 = arith.mulf %43, %52 : vector<8x1xf32>
    %54 = arith.subf %48, %53 : vector<8x1xf32>
    %55 = vector.broadcast %52 : vector<8x1xf32> to vector<8x2xf32>
    %56 = arith.mulf %55, %42 : vector<8x2xf32>
    %57 = vector.broadcast %54 : vector<8x1xf32> to vector<8x2xf32>
    %58 = arith.addf %56, %57 : vector<8x2xf32>
    %c0_27 = arith.constant 0 : index
    %c2 = arith.constant 2 : index
    %59 = vector.load %arg3[%c0_27, %c2] : memref<8x10xf32, #tpu.memory_space<vmem>>, vector<8x8xf32>
    %cst_28 = arith.constant dense<0.000000e+00> : vector<8x2xf32>
    %60 = tpu.matmul %59, %58, %cst_28 {dimension_numbers = #tpu.dot_dimension_numbers<[1], [0], [0], [1], [0, 0, 1, 1], [], []>} : vector<8x8xf32>, vector<8x2xf32>, vector<8x2xf32> -> vector<8x2xf32>
    %cst_29 = arith.constant 0.000000e+00 : f32
    %61 = vector.broadcast %cst_29 : f32 to vector<8x2xf32>
    %62 = arith.subf %61, %60 : vector<8x2xf32>
    %63 = math.exp %62 : vector<8x2xf32>
    %cst_30 = arith.constant 1.000000e+00 : f32
    %64 = vector.broadcast %cst_30 : f32 to vector<8x2xf32>
    %65 = arith.addf %64, %63 : vector<8x2xf32>
    %cst_31 = arith.constant 1.000000e+00 : f32
    %66 = vector.broadcast %cst_31 : f32 to vector<8x2xf32>
    %67 = arith.divf %66, %65 : vector<8x2xf32>
    %68 = vector.broadcast %52 : vector<8x1xf32> to vector<8x2xf32>
    %69 = arith.mulf %68, %67 : vector<8x2xf32>
    %70 = vector.broadcast %54 : vector<8x1xf32> to vector<8x2xf32>
    %71 = arith.mulf %70, %67 : vector<8x2xf32>
    %72 = tpu.concatenate %69, %71 in 0 : vector<8x2xf32>, vector<8x2xf32> -> vector<16x2xf32>
    %cst_32 = arith.constant 2.560000e+02 : f32
    %73 = vector.broadcast %cst_32 : f32 to vector<16x2xf32>
    %74 = arith.mulf %72, %73 : vector<16x2xf32>
    %75 = vector.extract_strided_slice %38 {offsets = [0, 0], sizes = [2, 768], strides = [1, 1]} : vector<3x768xf32> to vector<2x768xf32>
    %cst_33 = arith.constant dense<0.000000e+00> : vector<16x768xf32>
    %76 = tpu.matmul %74, %75, %cst_33 {dimension_numbers = #tpu.dot_dimension_numbers<[1], [0], [0], [1], [0, 0, 1, 1], [], []>} : vector<16x2xf32>, vector<2x768xf32>, vector<16x768xf32> -> vector<16x768xf32>
    %77 = vector.extract_strided_slice %76 {offsets = [0, 0], sizes = [8, 768], strides = [1, 1]} : vector<16x768xf32> to vector<8x768xf32>
    %78 = arith.mulf %77, %37 : vector<8x768xf32>
    %79 = vector.extract_strided_slice %76 {offsets = [8, 0], sizes = [8, 768], strides = [1, 1]} : vector<16x768xf32> to vector<8x768xf32>
    %80 = arith.addf %78, %79 : vector<8x768xf32>
    %cst_34 = arith.constant 0.000000e+00 : f32
    %81 = vector.broadcast %cst_34 : f32 to vector<8x768xf32>
    %82 = arith.maximumf %80, %81 : vector<8x768xf32>
    %c0_35 = arith.constant 0 : index
    %c0_36 = arith.constant 0 : index
    %83 = vector.load %arg5[%c0_35, %c0_36] : memref<8x768xf32, #tpu.memory_space<vmem>>, vector<8x768xf32>
    tpu.vector_store %arg5[%c0_35, %c0_36], %82 {strides = array<i32>} : memref<8x768xf32, #tpu.memory_space<vmem>>, vector<8x768xf32>,
    return
  }
  func.func @transform_0(%arg0: i32) -> (i32, i32) {
    %c0_i32 = arith.constant 0 : i32
    %c0_i32_0 = arith.constant 0 : i32
    %c0_i32_1 = arith.constant 0 : i32
    return %c0_i32, %c0_i32_0 : i32, i32
  }
  func.func @transform_1(%arg0: i32) -> (i32, i32) {
    %c0_i32 = arith.constant 0 : i32
    %c0_i32_0 = arith.constant 0 : i32
    %c0_i32_1 = arith.constant 0 : i32
    return %c0_i32, %c0_i32_0 : i32, i32
  }
  func.func @transform_2(%arg0: i32) -> (i32, i32) {
    %c0_i32 = arith.constant 0 : i32
    %c0_i32_0 = arith.constant 0 : i32
    %c0_i32_1 = arith.constant 0 : i32
    return %c0_i32, %c0_i32_0 : i32, i32
  }
  func.func @transform_3(%arg0: i32) -> (i32, i32) {
    %c0_i32 = arith.constant 0 : i32
    %c0_i32_0 = arith.constant 0 : i32
    %c0_i32_1 = arith.constant 0 : i32
    return %c0_i32, %c0_i32_0 : i32, i32
  }
  func.func @transform_4(%arg0: i32) -> (i32, i32) {
    %c0_i32 = arith.constant 0 : i32
    %c0_i32_0 = arith.constant 0 : i32
    %c0_i32_1 = arith.constant 0 : i32
    return %c0_i32, %c0_i32_0 : i32, i32
  }
}

</mosaic_0001>

<bundles_post_ra>
// kernel: tpu_custom_call.1
= control target key start
LH: loop header
LB: loop body
LE: loop exit
PB: predicated region body
PF: predicated region fallthrough
CT: control target
= control target key end

     0   :  { %9 = vsyncpa [#allocation3], 0  ;;  %s3787_s0 = inlined_call_operand.hbm [shape: f32[4,806], index: 0, kind: input, shape index: {}]   ;;  %s3788_s1 = inlined_call_operand.hbm [shape: f32[8,36], index: 1, kind: input, shape index: {}]   ;;  %s3789_s2 = inlined_call_operand.hbm [shape: f32[8,10], index: 2, kind: input, shape index: {}]   ;;  %s3790_s3 = inlined_call_operand.hbm [shape: f32[3,768], index: 3, kind: input, shape index: {}]   ;;  %s3791_s4 = inlined_call_operand.hbm [shape: f32[8,768], index: 4, kind: output, shape index: {}]  }
   0x1   :  { %10 = vsyncpa [#allocation6], 0 }
   0x2   :  { %11 = vsyncpa [#allocation9], 0 }
   0x3   :  { %12 = vsyncpa [#allocation4], 0  ;;  %s3329_s15 = smov [#allocation5]   ;;  %s3330_s17 = smov [#allocation2]  }
   0x4   :  { %s29_s16 = sshll.u32 %s3329_s15, 4  ;;  %s19_s18 = sshll.u32 %s3330_s17, 4  ;;  %s30_s16 = int_to_ptr.vmem [resolvable:$true] %s29_s16  ;;  %s20_s18 = int_to_ptr.vmem [resolvable:$true] %s19_s18 }
   0x5   :  { %s3211_s21 = scalar_lea.hbm %s3788_s1, 128 }
   0x6   :  { %p3212_p0 = scmp.ne.s32.totalorder %s3788_s1, %s3211_s21  ;;  %p3215_p1 = scmp.lt.u32.totalorder %s3211_s21, %s3788_s1 }
   0x8   :  { %p3217_p2 = pnand %p3215_p1, %p3212_p0 }
   0xa   :  { %3220 = shalt.err (!%p3217_p2)
}
   0xb   :  { %s3221_s26 = scalar_lea.vmem %s30_s16, 128  ;;  %p3226_p4 = scmp.lt.s32.totalorder %s30_s16, %s30_s16 }
   0xc   :  { %p3222_p3 = scmp.ne.s32.totalorder %s30_s16, %s3221_s26  ;;  %p3227_p5 = scmp.lt.s32.totalorder %s3221_s26, %s3221_s26 }
   0xe   :  { %p3228_p6 = por %p3227_p5, %p3226_p4 }
  0x10   :  { %p3229_p7 = pnand %p3228_p6, %p3222_p3 }
  0x12   :  { %3232 = shalt.err (!%p3229_p7)
}
  0x13   :  { %32 = dma.hbm_to_vmem [thread:$0]  %s3788_s1, 128, %s30_s16, [#allocation6]  }
  0x14   :  { %s3233_s5 = scalar_lea.hbm %s3787_s0, 448 }
  0x15   :  { %p3234_p8 = scmp.ne.s32.totalorder %s3787_s0, %s3233_s5  ;;  %p3237_p9 = scmp.lt.u32.totalorder %s3233_s5, %s3787_s0 }
  0x17   :  { %p3239_p10 = pnand %p3237_p9, %p3234_p8 }
  0x19   :  { %3242 = shalt.err (!%p3239_p10)
}
  0x1a   :  { %s3243_s10 = scalar_lea.vmem %s20_s18, 448  ;;  %p3248_p12 = scmp.lt.s32.totalorder %s20_s18, %s20_s18 }
  0x1b   :  { %p3244_p11 = scmp.ne.s32.totalorder %s20_s18, %s3243_s10  ;;  %p3249_p13 = scmp.lt.s32.totalorder %s3243_s10, %s3243_s10 }
  0x1d   :  { %p3250_p0 = por %p3249_p13, %p3248_p12 }
  0x1f   :  { %p3251_p1 = pnand %p3250_p0, %p3244_p11 }
  0x21   :  { %3254 = shalt.err (!%p3251_p1)
}
  0x22   :  { %22 = dma.hbm_to_vmem [thread:$0]  %s3787_s0, 448, %s20_s18, [#allocation3]  }
  0x23   :  { %s3331_s12 = smov [#allocation7]   ;;  %s3332_s14 = smov [#allocation8]  }
  0x24   :  { %s39_s13 = sshll.u32 %s3331_s12, 4  ;;  %s49_s15 = sshll.u32 %s3332_s14, 4  ;;  %s40_s13 = int_to_ptr.vmem [resolvable:$true] %s39_s13  ;;  %s50_s15 = int_to_ptr.vmem [resolvable:$true] %s49_s15 }
  0x25   :  { %s3255_s19 = scalar_lea.hbm %s3789_s2, 128 }
  0x26   :  { %p3256_p2 = scmp.ne.s32.totalorder %s3789_s2, %s3255_s19  ;;  %p3259_p3 = scmp.lt.u32.totalorder %s3255_s19, %s3789_s2 }
  0x28   :  { %p3261_p4 = pnand %p3259_p3, %p3256_p2 }
  0x2a   :  { %3264 = shalt.err (!%p3261_p4)
}
  0x2b   :  { %s3265_s0 = scalar_lea.vmem %s40_s13, 128  ;;  %p3270_p6 = scmp.lt.s32.totalorder %s40_s13, %s40_s13 }
  0x2c   :  { %p3266_p5 = scmp.ne.s32.totalorder %s40_s13, %s3265_s0  ;;  %p3271_p7 = scmp.lt.s32.totalorder %s3265_s0, %s3265_s0 }
  0x2e   :  { %p3272_p8 = por %p3271_p7, %p3270_p6 }
  0x30   :  { %p3273_p9 = pnand %p3272_p8, %p3266_p5 }
  0x32   :  { %3276 = shalt.err (!%p3273_p9)
}
  0x33   :  { %42 = dma.hbm_to_vmem [thread:$0]  %s3789_s2, 128, %s40_s13, [#allocation6]  }
  0x34   :  { %s3277_s27 = scalar_lea.hbm %s3790_s3, 384 }
  0x35   :  { %p3278_p10 = scmp.ne.s32.totalorder %s3790_s3, %s3277_s27  ;;  %p3281_p11 = scmp.lt.u32.totalorder %s3277_s27, %s3790_s3 }
  0x37   :  { %p3283_p12 = pnand %p3281_p11, %p3278_p10 }
  0x39   :  { %3286 = shalt.err (!%p3283_p12)
}
  0x3a   :  { %s3287_s6 = scalar_lea.vmem %s50_s15, 384  ;;  %p3292_p0 = scmp.lt.s32.totalorder %s50_s15, %s50_s15 }
  0x3b   :  { %p3288_p13 = scmp.ne.s32.totalorder %s50_s15, %s3287_s6  ;;  %p3293_p1 = scmp.lt.s32.totalorder %s3287_s6, %s3287_s6 }
  0x3d   :  { %p3294_p2 = por %p3293_p1, %p3292_p0 }
  0x3f   :  { %p3295_p3 = pnand %p3294_p2, %p3288_p13 }
  0x41   :  { %3298 = shalt.err (!%p3295_p3)
}
  0x42   :  { %52 = dma.hbm_to_vmem [thread:$0]  %s3790_s3, 384, %s50_s15, [#allocation9]  }
  0x43   :  { %3321 = dma.done.wait [#allocation3], 448  }
  0x44   :  { %3322 = vsyncadd [#allocation3], 4294966848 }
  0x45   :  { %3323 = dma.done.wait [#allocation6], 256  }
  0x46   :  { %3324 = vsyncadd [#allocation6], 4294967040 }
  0x47   :  { %3325 = dma.done.wait [#allocation9], 384  }
  0x48   :  { %3326 = vsyncadd [#allocation9], 4294966912  ;;  %v3333_v0 = vmov 0.0   ;;  %v3429_v1 = vld [vmem:[#allocation2 + $0x8] sm:$0xff]  ;;  %v3431_v2 = vld [vmem:[#allocation2] sm:$0xff]  ;;  %s3334_s8 = smov 127  }
  0x49   :  { %181 = vmatprep.mubr.f32.mxu0 %v3333_v0  ;;  %252 = vmatprep.mubr.f32.mxu1 %v3333_v0  ;;  %v3439_v3 = vcombine.high %v3431_v2, %v3431_v2  ;;  %v3441_v4 = vld [vmem:[#allocation5] sm:$0xff]  ;;  %v3443_v5 = vld [vmem:[#allocation2 + $0x10] sm:$0xff]  ;;  %s3335_s3 = smov 124   ;;  %v3452_v7 = vld [vmem:[#allocation2 + $0x18] sm:$0xf]  ;;  %v3460_v8 = vcombine.high %v3429_v1, %v3429_v1  ;;  %s3336_s9 = smov 126  }
  0x4a   :  { %84 = vrot.lane.b32.xlu0 %v3429_v1, %s3334_s8  ;;  %80 = vrot.lane.b32.xlu1 %v3431_v2, %s3334_s8  ;;  %v3450_v6 = vcombine.high %v3443_v5, %v3443_v5  ;;  %s3337_s10 = smov 120   ;;  %s3338_s1 = smov 110   ;;  %vm94_vm0 = vcmask 1039360   ;;  %vm104_vm1 = vcmask 1043456   ;;  %vm101_vm2 = vcmask 31744  }
  0x4b   :  { %s3339_s11 = smov 116   ;;  %s3340_s12 = smov 109   ;;  %vm575_vm3 = vcmask 1031168   ;;  %vm833_vm4 = vcmask 900096   ;;  %vm1091_vm5 = vcmask 891904   ;;  %vm1349_vm6 = vcmask 883712  }
  0x4c   :  { %s3341_s13 = smov 112   ;;  %s3342_s14 = smov 108   ;;  %vm1607_vm7 = vcmask 752640   ;;  %vm1865_vm8 = vcmask 744448   ;;  %vm2123_vm9 = vcmask 736256   ;;  %vm3352_vm10 = vmmov 0  }
  0x4d   :  { %s3343_s15 = smov 92   ;;  %s3344_s16 = smov 104   ;;  %vm2640_vm11 = vcmask 64512   ;;  %vm2730_vm12 = vcmask 1041408   ;;  %vm2723_vm13 = vcmask 15360  }
  0x4e   :  { %71 = vrot.lane.b32.xlu1 %v3441_v4, %s3335_s3  ;;  %82 = vrot.lane.b32.xlu0 %v3439_v3, %s3334_s8  ;;  %s3345_s17 = smov 91   ;;  %s3346_s19 = smov 100  }
  0x4f   :  { %s3347_s20 = smov 90   ;;  %s3348_s21 = smov 96  }
  0x50   :  { %s3350_s22 = smov 2   ;;  %s3353_s23 = smov [#allocation10]  }
  0x51   :  { %s3004_s0 = sshll.u32 %s3353_s23, 4  ;;  %s3005_s0 = int_to_ptr.vmem [resolvable:$true] %s3004_s0 }
  0x52   :  { %92 = vrot.lane.b32.xlu1 %v3452_v7, %s3334_s8  ;;  %90 = vrot.lane.b32.xlu0 %v3450_v6, %s3334_s8  ;;  %s3299_s18 = scalar_lea.vmem %s3005_s0, 768  ;;  %p3304_p5 = scmp.lt.s32.totalorder %s3005_s0, %s3005_s0 }
  0x53   :  { %p3300_p4 = scmp.ne.s32.totalorder %s3005_s0, %s3299_s18  ;;  %p3305_p6 = scmp.lt.s32.totalorder %s3299_s18, %s3299_s18 }
  0x55   :  { %p3306_p7 = por %p3305_p6, %p3304_p5 }
  0x56   :  { %86 = vrot.lane.b32.xlu1 %v3460_v8, %s3334_s8  ;;  %88 = vrot.lane.b32.xlu0 %v3443_v5, %s3334_s8 }
  0x57   :  { %p3307_p8 = pnand %p3306_p7, %p3300_p4 }
  0x5a   :  { %565 = vrot.lane.b32.xlu1 %v3429_v1, %s3336_s9  ;;  %563 = vrot.lane.b32.xlu0 %v3439_v3, %s3336_s9 }
  0x5e   :  { %559 = vrot.lane.b32.xlu1 %v3441_v4, %s3337_s10  ;;  %561 = vrot.lane.b32.xlu0 %v3431_v2, %s3336_s9 }
  0x62   :  { %573 = vrot.lane.b32.xlu1 %v3452_v7, %s3336_s9  ;;  %571 = vrot.lane.b32.xlu0 %v3450_v6, %s3336_s9 }
  0x66   :  { %567 = vrot.lane.b32.xlu1 %v3460_v8, %s3336_s9  ;;  %569 = vrot.lane.b32.xlu0 %v3443_v5, %s3336_s9 }
  0x6a   :  { %823 = vrot.lane.b32.xlu1 %v3429_v1, %s3338_s1  ;;  %821 = vrot.lane.b32.xlu0 %v3439_v3, %s3338_s1 }
  0x6e   :  { %817 = vrot.lane.b32.xlu1 %v3441_v4, %s3339_s11  ;;  %819 = vrot.lane.b32.xlu0 %v3431_v2, %s3338_s1 }
  0x72   :  { %831 = vrot.lane.b32.xlu1 %v3452_v7, %s3338_s1  ;;  %829 = vrot.lane.b32.xlu0 %v3450_v6, %s3338_s1 }
  0x76   :  { %825 = vrot.lane.b32.xlu1 %v3460_v8, %s3338_s1  ;;  %827 = vrot.lane.b32.xlu0 %v3443_v5, %s3338_s1 }
  0x7a   :  { %1081 = vrot.lane.b32.xlu1 %v3429_v1, %s3340_s12  ;;  %1079 = vrot.lane.b32.xlu0 %v3439_v3, %s3340_s12 }
  0x7e   :  { %1075 = vrot.lane.b32.xlu1 %v3441_v4, %s3341_s13  ;;  %1077 = vrot.lane.b32.xlu0 %v3431_v2, %s3340_s12 }
  0x82   :  { %1089 = vrot.lane.b32.xlu1 %v3452_v7, %s3340_s12  ;;  %1087 = vrot.lane.b32.xlu0 %v3450_v6, %s3340_s12 }
  0x86   :  { %1083 = vrot.lane.b32.xlu1 %v3460_v8, %s3340_s12  ;;  %1085 = vrot.lane.b32.xlu0 %v3443_v5, %s3340_s12 }
  0x8a   :  { %1339 = vrot.lane.b32.xlu1 %v3429_v1, %s3342_s14  ;;  %1337 = vrot.lane.b32.xlu0 %v3439_v3, %s3342_s14 }
  0x8e   :  { %1333 = vrot.lane.b32.xlu1 %v3441_v4, %s3342_s14  ;;  %1335 = vrot.lane.b32.xlu0 %v3431_v2, %s3342_s14 }
  0x92   :  { %1347 = vrot.lane.b32.xlu1 %v3452_v7, %s3342_s14  ;;  %1345 = vrot.lane.b32.xlu0 %v3450_v6, %s3342_s14 }
  0x96   :  { %1341 = vrot.lane.b32.xlu1 %v3460_v8, %s3342_s14  ;;  %1343 = vrot.lane.b32.xlu0 %v3443_v5, %s3342_s14 }
  0x9a   :  { %1597 = vrot.lane.b32.xlu1 %v3429_v1, %s3343_s15  ;;  %1595 = vrot.lane.b32.xlu0 %v3439_v3, %s3343_s15 }
  0x9e   :  { %1591 = vrot.lane.b32.xlu1 %v3441_v4, %s3344_s16  ;;  %1593 = vrot.lane.b32.xlu0 %v3431_v2, %s3343_s15 }
  0xa2   :  { %1605 = vrot.lane.b32.xlu1 %v3452_v7, %s3343_s15  ;;  %1603 = vrot.lane.b32.xlu0 %v3450_v6, %s3343_s15 }
  0xa6   :  { %1599 = vrot.lane.b32.xlu1 %v3460_v8, %s3343_s15  ;;  %1601 = vrot.lane.b32.xlu0 %v3443_v5, %s3343_s15 }
  0xaa   :  { %1855 = vrot.lane.b32.xlu1 %v3429_v1, %s3345_s17  ;;  %1853 = vrot.lane.b32.xlu0 %v3439_v3, %s3345_s17 }
  0xae   :  { %1849 = vrot.lane.b32.xlu1 %v3441_v4, %s3346_s19  ;;  %1851 = vrot.lane.b32.xlu0 %v3431_v2, %s3345_s17 }
  0xb2   :  { %1863 = vrot.lane.b32.xlu1 %v3452_v7, %s3345_s17  ;;  %1861 = vrot.lane.b32.xlu0 %v3450_v6, %s3345_s17 }
  0xb6   :  { %1857 = vrot.lane.b32.xlu1 %v3460_v8, %s3345_s17  ;;  %1859 = vrot.lane.b32.xlu0 %v3443_v5, %s3345_s17 }
  0xba   :  { %2113 = vrot.lane.b32.xlu1 %v3429_v1, %s3347_s20  ;;  %2111 = vrot.lane.b32.xlu0 %v3439_v3, %s3347_s20 }
  0xbc   :  { %v85_v9 = vpop.permute.xlu0 %84  ;;  %v81_v10 = vpop.permute.xlu1 %80 }
  0xbe   :  { %2107 = vrot.lane.b32.xlu1 %v3441_v4, %s3348_s21  ;;  %2109 = vrot.lane.b32.xlu0 %v3431_v2, %s3347_s20 }
  0xc0   :  { %v72_v11 = vpop.permute.xlu1 %71  ;;  %v83_v12 = vpop.permute.xlu0 %82 }
  0xc1   :  { %v96_v13 = vsel %vm94_vm0, %v83_v12, %v85_v9  ;;  %v95_v14 = vsel %vm94_vm0, %v81_v10, %v83_v12 }
  0xc2   :  { %2117 = vrot.lane.b32.xlu1 %v3443_v5, %s3347_s20  ;;  %2115 = vrot.lane.b32.xlu0 %v3460_v8, %s3347_s20 }
  0xc3   :  { %3015 = vmatprep.subr.msk.mxu0 %vm104_vm1, %v96_v13 }
  0xc4   :  { %3016 = vmatpush1.msk.msra.mxu0 %vm104_vm1, %v95_v14  ;;  %v93_v15 = vpop.permute.xlu1 %92  ;;  %v91_v16 = vpop.permute.xlu0 %90 }
  0xc5   :  { %3017 = vmatmul.mubr.msk.f32.vlgmr.msra.gmra.mrb[0].mxu0 %vm101_vm2, %v72_v11  ;;  %v100_v17 = vsel %vm94_vm0, %v91_v16, %v93_v15 }
  0xc6   :  { %2121 = vrot.lane.b32.xlu1 %v3452_v7, %s3347_s20  ;;  %2119 = vrot.lane.b32.xlu0 %v3450_v6, %s3347_s20 }
  0xc7   :  { %3021 = vmatprep.subr.msk.mxu0 %vm104_vm1, %v100_v17  ;;  %323 = vmatprep.mubr.f32.mxu0 %v3333_v0 }
  0xc8   :  { %v87_v18 = vpop.permute.xlu1 %86  ;;  %v89_v19 = vpop.permute.xlu0 %88 }
  0xc9   :  { %v99_v20 = vsel %vm94_vm0, %v89_v19, %v91_v16  ;;  %v98_v21 = vsel %vm94_vm0, %v87_v18, %v89_v19  ;;  %v97_v22 = vsel %vm94_vm0, %v85_v9, %v87_v18 }
  0xca   :  { %3018 = vmatprep.subr.msk.mxu1 %vm104_vm1, %v98_v21  ;;  %3022 = vmatpush1.msk.msra.mxu0 %vm104_vm1, %v99_v20 }
  0xcb   :  { %3019 = vmatpush1.msk.msra.mxu1 %vm104_vm1, %v97_v22  ;;  %3023 = vmatmul.mubr.msk.f32.vlgmr.msra.gmra.mrb[2].mxu0 %vm101_vm2, %v72_v11 }
  0xcc   :  { %v566_v23 = vpop.permute.xlu1 %565  ;;  %3020 = vmatmul.mubr.msk.f32.vlgmr.msra.gmra.mrb[0].mxu1 %vm101_vm2, %v72_v11  ;;  %3024 = vmatprep.subr.msk.mxu0 %vm104_vm1, %v3439_v3  ;;  %v564_v24 = vpop.permute.xlu0 %563 }
  0xcd   :  { %3025 = vmatpush1.msk.msra.mxu0 %vm104_vm1, %v3431_v2  ;;  %408 = vmatprep.mubr.f32.mxu0 %v3333_v0  ;;  %v577_v25 = vsel %vm575_vm3, %v564_v24, %v566_v23 }
  0xce   :  { %3030 = vmatprep.subr.msk.mxu0 %vm104_vm1, %v3450_v6  ;;  %3027 = vmatprep.subr.msk.mxu1 %vm104_vm1, %v3460_v8 }
  0xcf   :  { %3026 = vmatmul.mubr.msk.f32.vlgmr.msra.gmra.mrb[0].mxu0 %vm101_vm2, %v3441_v4  ;;  %3028 = vmatpush1.msk.msra.mxu1 %vm104_vm1, %v3429_v1 }
  0xd0   :  { %3031 = vmatpush1.msk.msra.mxu0 %vm104_vm1, %v3443_v5  ;;  %v560_v26 = vpop.permute.xlu1 %559  ;;  %v562_v27 = vpop.permute.xlu0 %561  ;;  %550 = vmatprep.mubr.f32.mxu0 %v3333_v0 }
  0xd1   :  { %3033 = vmatprep.subr.msk.mxu0 %vm104_vm1, %v577_v25  ;;  %v576_v28 = vsel %vm575_vm3, %v562_v27, %v564_v24  ;;  %479 = vmatprep.mubr.f32.mxu1 %v3333_v0 }
  0xd3   :  { %3032 = vmatmul.mubr.msk.f32.vlgmr.msra.gmra.mrb[2].mxu0 %vm101_vm2, %v3441_v4 }
  0xd4   :  { %3034 = vmatpush1.msk.msra.mxu0 %vm104_vm1, %v576_v28  ;;  %v574_v29 = vpop.permute.xlu1 %573  ;;  %3029 = vmatmul.mubr.msk.f32.vlgmr.msra.gmra.mrb[0].mxu1 %vm101_vm2, %v3441_v4  ;;  %v572_v30 = vpop.permute.xlu0 %571 }
  0xd5   :  { %v581_v31 = vsel %vm575_vm3, %v572_v30, %v574_v29  ;;  %660 = vmatprep.mubr.f32.mxu0 %v3333_v0  ;;  %731 = vmatprep.mubr.f32.mxu1 %v3333_v0 }
  0xd6   :  { %3039 = vmatprep.subr.msk.mxu0 %vm104_vm1, %v581_v31 }
  0xd7   :  { %3035 = vmatmul.mubr.msk.f32.vlgmr.msra.gmra.mrb[0].mxu0 %vm101_vm2, %v560_v26 }
  0xd8   :  { %v568_v32 = vpop.permute.xlu1 %567  ;;  %v570_v33 = vpop.permute.xlu0 %569  ;;  %802 = vmatprep.mubr.f32.mxu0 %v3333_v0 }
  0xd9   :  { %v578_v34 = vsel %vm575_vm3, %v566_v23, %v568_v32  ;;  %v579_v35 = vsel %vm575_vm3, %v568_v32, %v570_v33  ;;  %v580_v36 = vsel %vm575_vm3, %v570_v33, %v572_v30 }
  0xda   :  { %3036 = vmatprep.subr.msk.mxu1 %vm104_vm1, %v579_v35  ;;  %3040 = vmatpush1.msk.msra.mxu0 %vm104_vm1, %v580_v36 }
  0xdb   :  { %3037 = vmatpush1.msk.msra.mxu1 %vm104_vm1, %v578_v34  ;;  %3041 = vmatmul.mubr.msk.f32.vlgmr.msra.gmra.mrb[2].mxu0 %vm101_vm2, %v560_v26 }
  0xdc   :  { %v824_v37 = vpop.permute.xlu1 %823  ;;  %3038 = vmatmul.mubr.msk.f32.vlgmr.msra.gmra.mrb[0].mxu1 %vm101_vm2, %v560_v26  ;;  %v822_v38 = vpop.permute.xlu0 %821  ;;  %918 = vmatprep.mubr.f32.mxu0 %v3333_v0 }
  0xdd   :  { %v835_v39 = vsel %vm833_vm4, %v822_v38, %v824_v37  ;;  %989 = vmatprep.mubr.f32.mxu1 %v3333_v0 }
  0xde   :  { %3042 = vmatprep.subr.msk.mxu0 %vm104_vm1, %v835_v39 }
  0xe0   :  { %v818_v40 = vpop.permute.xlu1 %817  ;;  %v820_v41 = vpop.permute.xlu0 %819 }
  0xe1   :  { %v834_v42 = vsel %vm833_vm4, %v820_v41, %v822_v38 }
  0xe2   :  { %3043 = vmatpush1.msk.msra.mxu0 %vm104_vm1, %v834_v42 }
  0xe3   :  { %3044 = vmatmul.mubr.msk.f32.vlgmr.msra.gmra.mrb[0].mxu0 %vm101_vm2, %v818_v40 }
  0xe4   :  { %v832_v43 = vpop.permute.xlu1 %831  ;;  %v830_v44 = vpop.permute.xlu0 %829  ;;  %1060 = vmatprep.mubr.f32.mxu0 %v3333_v0 }
  0xe5   :  { %v839_v45 = vsel %vm833_vm4, %v830_v44, %v832_v43 }
  0xe6   :  { %3048 = vmatprep.subr.msk.mxu0 %vm104_vm1, %v839_v45 }
  0xe8   :  { %v826_v46 = vpop.permute.xlu1 %825  ;;  %v828_v47 = vpop.permute.xlu0 %827 }
  0xe9   :  { %v836_v48 = vsel %vm833_vm4, %v824_v37, %v826_v46  ;;  %v837_v49 = vsel %vm833_vm4, %v826_v46, %v828_v47  ;;  %v838_v50 = vsel %vm833_vm4, %v828_v47, %v830_v44 }
  0xea   :  { %3045 = vmatprep.subr.msk.mxu1 %vm104_vm1, %v837_v49  ;;  %3049 = vmatpush1.msk.msra.mxu0 %vm104_vm1, %v838_v50  ;;  %v3679_v50 = vld [vmem:[#allocation8] sm:$0x77] }
  0xeb   :  { %3046 = vmatpush1.msk.msra.mxu1 %vm104_vm1, %v836_v48  ;;  %3050 = vmatmul.mubr.msk.f32.vlgmr.msra.gmra.mrb[2].mxu0 %vm101_vm2, %v818_v40 }
  0xec   :  { %v1082_v51 = vpop.permute.xlu1 %1081  ;;  %3047 = vmatmul.mubr.msk.f32.vlgmr.msra.gmra.mrb[0].mxu1 %vm101_vm2, %v818_v40  ;;  %v1080_v52 = vpop.permute.xlu0 %1079  ;;  %1176 = vmatprep.mubr.f32.mxu0 %v3333_v0 }
  0xed   :  { %v1093_v53 = vsel %vm1091_vm5, %v1080_v52, %v1082_v51  ;;  %1247 = vmatprep.mubr.f32.mxu1 %v3333_v0 }
  0xee   :  { %3051 = vmatprep.subr.msk.mxu0 %vm104_vm1, %v1093_v53  ;;  %v3686_v53 = vcombine.high %v3679_v50, %v3679_v50 }
  0xf0   :  { %v1076_v54 = vpop.permute.xlu1 %1075  ;;  %v1078_v55 = vpop.permute.xlu0 %1077 }
  0xf1   :  { %v1092_v56 = vsel %vm1091_vm5, %v1078_v55, %v1080_v52 }
  0xf2   :  { %3052 = vmatpush1.msk.msra.mxu0 %vm104_vm1, %v1092_v56 }
  0xf3   :  { %3053 = vmatmul.mubr.msk.f32.vlgmr.msra.gmra.mrb[0].mxu0 %vm101_vm2, %v1076_v54 }
  0xf4   :  { %v1090_v57 = vpop.permute.xlu1 %1089  ;;  %v1088_v58 = vpop.permute.xlu0 %1087  ;;  %1318 = vmatprep.mubr.f32.mxu0 %v3333_v0 }
  0xf5   :  { %v1097_v59 = vsel %vm1091_vm5, %v1088_v58, %v1090_v57 }
  0xf6   :  { %3057 = vmatprep.subr.msk.mxu0 %vm104_vm1, %v1097_v59 }
  0xf8   :  { %v1084_v60 = vpop.permute.xlu1 %1083  ;;  %v1086_v61 = vpop.permute.xlu0 %1085 }
  0xf9   :  { %v1094_v62 = vsel %vm1091_vm5, %v1082_v51, %v1084_v60  ;;  %v1095_v63 = vsel %vm1091_vm5, %v1084_v60, %v1086_v61  ;;  %v1096_v1 = vsel %vm1091_vm5, %v1086_v61, %v1088_v58  ;;  %v3701_v60 = vld [vmem:[#allocation8 + $0x8] sm:$0x77] }
  0xfa   :  { %3054 = vmatprep.subr.msk.mxu1 %vm104_vm1, %v1095_v63  ;;  %3058 = vmatpush1.msk.msra.mxu0 %vm104_vm1, %v1096_v1  ;;  %v3705_v61 = vcombine.high %v3701_v60, %v3701_v60 }
  0xfb   :  { %3055 = vmatpush1.msk.msra.mxu1 %vm104_vm1, %v1094_v62  ;;  %3059 = vmatmul.mubr.msk.f32.vlgmr.msra.gmra.mrb[2].mxu0 %vm101_vm2, %v1076_v54  ;;  %v3708_v62 = vld [vmem:[#allocation8 + $0x10] sm:$0x77] }
  0xfc   :  { %v1340_v2 = vpop.permute.xlu1 %1339  ;;  %3056 = vmatmul.mubr.msk.f32.vlgmr.msra.gmra.mrb[0].mxu1 %vm101_vm2, %v1076_v54  ;;  %v1338_v3 = vpop.permute.xlu0 %1337  ;;  %1434 = vmatprep.mubr.f32.mxu0 %v3333_v0 }
  0xfd   :  { %v1351_v4 = vsel %vm1349_vm6, %v1338_v3, %v1340_v2  ;;  %1505 = vmatprep.mubr.f32.mxu1 %v3333_v0 }
  0xfe   :  { %3060 = vmatprep.subr.msk.mxu0 %vm104_vm1, %v1351_v4 }
 0x100   :  { %v1334_v5 = vpop.permute.xlu1 %1333  ;;  %v1336_v6 = vpop.permute.xlu0 %1335 }
 0x101   :  { %v1350_v7 = vsel %vm1349_vm6, %v1336_v6, %v1338_v3 }
 0x102   :  { %3061 = vmatpush1.msk.msra.mxu0 %vm104_vm1, %v1350_v7 }
 0x103   :  { %3062 = vmatmul.mubr.msk.f32.vlgmr.msra.gmra.mrb[0].mxu0 %vm101_vm2, %v1334_v5 }
 0x104   :  { %v1348_v8 = vpop.permute.xlu1 %1347  ;;  %v1346_v9 = vpop.permute.xlu0 %1345  ;;  %1576 = vmatprep.mubr.f32.mxu0 %v3333_v0 }
 0x105   :  { %v1355_v10 = vsel %vm1349_vm6, %v1346_v9, %v1348_v8 }
 0x106   :  { %3066 = vmatprep.subr.msk.mxu0 %vm104_vm1, %v1355_v10 }
 0x108   :  { %v1342_v11 = vpop.permute.xlu1 %1341  ;;  %v1344_v12 = vpop.permute.xlu0 %1343 }
 0x109   :  { %v1352_v13 = vsel %vm1349_vm6, %v1340_v2, %v1342_v11  ;;  %v1353_v14 = vsel %vm1349_vm6, %v1342_v11, %v1344_v12  ;;  %v1354_v15 = vsel %vm1349_vm6, %v1344_v12, %v1346_v9  ;;  %v3716_v2 = vcombine.high %v3708_v62, %v3708_v62 }
 0x10a   :  { %3063 = vmatprep.subr.msk.mxu1 %vm104_vm1, %v1353_v14  ;;  %3067 = vmatpush1.msk.msra.mxu0 %vm104_vm1, %v1354_v15 }
 0x10b   :  { %3064 = vmatpush1.msk.msra.mxu1 %vm104_vm1, %v1352_v13  ;;  %3068 = vmatmul.mubr.msk.f32.vlgmr.msra.gmra.mrb[2].mxu0 %vm101_vm2, %v1334_v5 }
 0x10c   :  { %v1598_v16 = vpop.permute.xlu1 %1597  ;;  %3065 = vmatmul.mubr.msk.f32.vlgmr.msra.gmra.mrb[0].mxu1 %vm101_vm2, %v1334_v5  ;;  %v1596_v17 = vpop.permute.xlu0 %1595  ;;  %1692 = vmatprep.mubr.f32.mxu0 %v3333_v0 }
 0x10d   :  { %v1609_v18 = vsel %vm1607_vm7, %v1596_v17, %v1598_v16  ;;  %1763 = vmatprep.mubr.f32.mxu1 %v3333_v0 }
 0x10e   :  { %3069 = vmatprep.subr.msk.mxu0 %vm104_vm1, %v1609_v18 }
 0x110   :  { %v1592_v19 = vpop.permute.xlu1 %1591  ;;  %v1594_v20 = vpop.permute.xlu0 %1593 }
 0x111   :  { %v1608_v21 = vsel %vm1607_vm7, %v1594_v20, %v1596_v17  ;;  %v3349_v20 = vmov 0  }
 0x112   :  { %3070 = vmatpush1.msk.msra.mxu0 %vm104_vm1, %v1608_v21  ;;  %3197 = vset.pattern.permute.xlu1 %v3349_v20 }
 0x113   :  { %3071 = vmatmul.mubr.msk.f32.vlgmr.msra.gmra.mrb[0].mxu0 %vm101_vm2, %v1592_v19 }
 0x114   :  { %v1606_v22 = vpop.permute.xlu1 %1605  ;;  %v1604_v23 = vpop.permute.xlu0 %1603  ;;  %1834 = vmatprep.mubr.f32.mxu0 %v3333_v0 }
 0x115   :  { %v1613_v24 = vsel %vm1607_vm7, %v1604_v23, %v1606_v22  ;;  %v2608_v22 = vld [vmem:[#allocation7] sm:$0xff] }
 0x116   :  { %3075 = vmatprep.subr.msk.mxu0 %vm104_vm1, %v1613_v24 }
 0x118   :  { %v1600_v25 = vpop.permute.xlu1 %1599  ;;  %v1602_v26 = vpop.permute.xlu0 %1601 }
 0x119   :  { %v1610_v27 = vsel %vm1607_vm7, %v1598_v16, %v1600_v25  ;;  %v1611_v28 = vsel %vm1607_vm7, %v1600_v25, %v1602_v26  ;;  %v1612_v29 = vsel %vm1607_vm7, %v1602_v26, %v1604_v23  ;;  %v3351_v25 = vmov 1  }
 0x11a   :  { %3072 = vmatprep.subr.msk.mxu1 %vm104_vm1, %v1611_v28  ;;  %3076 = vmatpush1.msk.msra.mxu0 %vm104_vm1, %v1612_v29 }
 0x11b   :  { %3073 = vmatpush1.msk.msra.mxu1 %vm104_vm1, %v1610_v27  ;;  %3077 = vmatmul.mubr.msk.f32.vlgmr.msra.gmra.mrb[2].mxu0 %vm101_vm2, %v1592_v19 }
 0x11c   :  { %v1856_v30 = vpop.permute.xlu1 %1855  ;;  %3074 = vmatmul.mubr.msk.f32.vlgmr.msra.gmra.mrb[0].mxu1 %vm101_vm2, %v1592_v19  ;;  %v1854_v31 = vpop.permute.xlu0 %1853  ;;  %1950 = vmatprep.mubr.f32.mxu0 %v3333_v0 }
 0x11d   :  { %v1867_v32 = vsel %vm1865_vm8, %v1854_v31, %v1856_v30  ;;  %2021 = vmatprep.mubr.f32.mxu1 %v3333_v0  ;;  %3198 = vset.pattern.permute.xlu0 %v3351_v25 }
 0x11e   :  { %3078 = vmatprep.subr.msk.mxu0 %vm104_vm1, %v1867_v32 }
 0x120   :  { %v1850_v33 = vpop.permute.xlu1 %1849  ;;  %v1852_v34 = vpop.permute.xlu0 %1851 }
 0x121   :  { %v1866_v35 = vsel %vm1865_vm8, %v1852_v34, %v1854_v31 }
 0x122   :  { %3079 = vmatpush1.msk.msra.mxu0 %vm104_vm1, %v1866_v35 }
 0x123   :  { %3080 = vmatmul.mubr.msk.f32.vlgmr.msra.gmra.mrb[0].mxu0 %vm101_vm2, %v1850_v33 }
 0x124   :  { %v1864_v36 = vpop.permute.xlu1 %1863  ;;  %v1862_v37 = vpop.permute.xlu0 %1861  ;;  %2092 = vmatprep.mubr.f32.mxu0 %v3333_v0 }
 0x125   :  { %v1871_v38 = vsel %vm1865_vm8, %v1862_v37, %v1864_v36 }
 0x126   :  { %3084 = vmatprep.subr.msk.mxu0 %vm104_vm1, %v1871_v38 }
 0x128   :  { %v1858_v39 = vpop.permute.xlu1 %1857  ;;  %v1860_v40 = vpop.permute.xlu0 %1859 }
 0x129   :  { %v1868_v41 = vsel %vm1865_vm8, %v1856_v30, %v1858_v39  ;;  %v1869_v42 = vsel %vm1865_vm8, %v1858_v39, %v1860_v40  ;;  %v1870_v43 = vsel %vm1865_vm8, %v1860_v40, %v1862_v37 }
 0x12a   :  { %3081 = vmatprep.subr.msk.mxu1 %vm104_vm1, %v1869_v42  ;;  %3085 = vmatpush1.msk.msra.mxu0 %vm104_vm1, %v1870_v43 }
 0x12b   :  { %3082 = vmatpush1.msk.msra.mxu1 %vm104_vm1, %v1868_v41  ;;  %3086 = vmatmul.mubr.msk.f32.vlgmr.msra.gmra.mrb[2].mxu0 %vm101_vm2, %v1850_v33 }
 0x12c   :  { %v2114_v44 = vpop.permute.xlu1 %2113  ;;  %3083 = vmatmul.mubr.msk.f32.vlgmr.msra.gmra.mrb[0].mxu1 %vm101_vm2, %v1850_v33  ;;  %v2112_v45 = vpop.permute.xlu0 %2111  ;;  %2208 = vmatprep.mubr.f32.mxu0 %v3333_v0 }
 0x12d   :  { %v2125_v46 = vsel %vm2123_vm9, %v2112_v45, %v2114_v44  ;;  %2279 = vmatprep.mubr.f32.mxu1 %v3333_v0 }
 0x12e   :  { %3087 = vmatprep.subr.msk.mxu0 %vm104_vm1, %v2125_v46 }
 0x130   :  { %v2108_v47 = vpop.permute.xlu1 %2107  ;;  %v2110_v48 = vpop.permute.xlu0 %2109 }
 0x131   :  { %v2124_v49 = vsel %vm2123_vm9, %v2110_v48, %v2112_v45 }
 0x132   :  { %3088 = vmatpush1.msk.msra.mxu0 %vm104_vm1, %v2124_v49 }
 0x133   :  { %3089 = vmatmul.mubr.msk.f32.vlgmr.msra.gmra.mrb[0].mxu0 %vm101_vm2, %v2108_v47 }
 0x134   :  { %v2118_v51 = vpop.permute.xlu1 %2117  ;;  %v2116_v52 = vpop.permute.xlu0 %2115  ;;  %2350 = vmatprep.mubr.f32.mxu0 %v3333_v0 }
 0x135   :  { %v2126_v54 = vsel %vm2123_vm9, %v2114_v44, %v2116_v52  ;;  %v2127_v55 = vsel %vm2123_vm9, %v2116_v52, %v2118_v51 }
 0x136   :  { %3090 = vmatprep.subr.msk.mxu1 %vm104_vm1, %v2127_v55 }
 0x137   :  { %3091 = vmatpush1.msk.msra.mxu1 %vm104_vm1, %v2126_v54 }
 0x138   :  { %v2122_v56 = vpop.permute.xlu1 %2121  ;;  %3092 = vmatmul.mubr.msk.f32.vlgmr.msra.gmra.mrb[0].mxu1 %vm101_vm2, %v2108_v47  ;;  %v2120_v57 = vpop.permute.xlu0 %2119  ;;  %2381 = vmatprep.subr.mxu1 %v3686_v53 }
 0x139   :  { %v2128_v58 = vsel %vm2123_vm9, %v2118_v51, %v2120_v57  ;;  %v2129_v59 = vsel %vm2123_vm9, %v2120_v57, %v2122_v56 }
 0x13a   :  { %3093 = vmatprep.subr.msk.mxu0 %vm104_vm1, %v2129_v59 }
 0x13b   :  { %3094 = vmatpush1.msk.msra.mxu0 %vm104_vm1, %v2128_v58 }
 0x13c   :  { %3095 = vmatmul.mubr.msk.f32.vlgmr.msra.gmra.mrb[2].mxu0 %vm101_vm2, %v2108_v47  ;;  %3101 = vmatprep.subr.msk.mxu0 %vm2730_vm12, %v3705_v61 }
 0x13d   :  { %2884 = vmatprep.mubr.f32.mxu0 %v3333_v0  ;;  %3102 = vmatpush1.msk.msra.mxu0 %vm2730_vm12, %v3701_v60 }
 0x13e   :  { %2382 = vmatpush1.xpose.msra.mxu1 %v3679_v50 }
 0x13f   :  { %2456 = vmatprep.subr.mxu1 %v3705_v61 }
 0x206   :  { %v3710_v63 = vpop.f32.mrb[0].mxu0 }
 0x207   :  { %v3712_v1 = vpop.f32.mrb[1].mxu0  ;;  %v2366_v4 = vmul.f32 %v3710_v63, %v3710_v63 }
 0x208   :  { %v2367_v3 = vmul.f32 %v3712_v1, %v3712_v1  ;;  %2445 = vmatprep.mubr.f32.mxu1 %v3712_v1 }
 0x209   :  { %2446 = vmatmul.mubr.f32.vlgmr.msra.gmra.mrb[2].mxu1 %v3710_v63 }
 0x20a   :  { %2450 = vmatprep.mubr.f32.mxu1 %v2367_v3  ;;  %2457 = vmatpush1.xpose.msra.mxu1 %v3701_v60 }
 0x20b   :  { %v3725_v5 = vpop.f32.mrb[0].mxu1  ;;  %2531 = vmatprep.subr.mxu1 %v3716_v2 }
 0x20c   :  { %v3728_v6 = vpop.f32.mrb[1].mxu1  ;;  %v2368_v10 = vmul.f32 %v3725_v5, %v3725_v5 }
 0x20d   :  { %2451 = vmatmul.mubr.f32.gmra.mrb[4].mxu1 %v2366_v4  ;;  %v2369_v8 = vmul.f32 %v3728_v6, %v3728_v6 }
 0x20e   :  { %2520 = vmatprep.mubr.f32.mxu1 %v3728_v6 }
 0x20f   :  { %v3731_v7 = vpop.f32.mrb[2].mxu0 }
 0x210   :  { %v3735_v9 = vpop.f32.mrb[3].mxu0  ;;  %v2370_v12 = vmul.f32 %v3731_v7, %v3731_v7 }
 0x211   :  { %2521 = vmatmul.mubr.f32.vlgmr.msra.gmra.mrb[2].mxu1 %v3725_v5  ;;  %v2371_v11 = vmul.f32 %v3735_v9, %v3735_v9 }
 0x212   :  { %2525 = vmatprep.mubr.f32.mxu1 %v2369_v8  ;;  %2532 = vmatpush1.xpose.msra.mxu1 %v3708_v62 }
 0x213   :  { %3111 = vmatprep.subr.mxu1 %v3333_v0 }
 0x215   :  { %2526 = vmatmul.mubr.f32.gmra.mrb[4].mxu1 %v2368_v10 }
 0x216   :  { %2595 = vmatprep.mubr.f32.mxu1 %v3735_v9 }
 0x219   :  { %2596 = vmatmul.mubr.f32.vlgmr.msra.gmra.mrb[2].mxu1 %v3731_v7 }
 0x21a   :  { %2600 = vmatprep.mubr.f32.mxu1 %v2371_v11 }
 0x21d   :  { %2601 = vmatmul.mubr.f32.gmra.mrb[4].mxu1 %v2370_v12 }
 0x21e   :  { %3113 = vmatprep.mubr.msk.f32.mxu1 %vm3352_vm10, %v3333_v0 }
 0x2ec   :  { %v2597_v13 = vpop.f32.mrb[2].mxu1 }
 0x2ed   :  { %v2599_v14 = vpop.f32.mrb[3].mxu1  ;;  %v2606_v15 = vmul.f32 %v2597_v13, %v2597_v13 }
 0x2f0   :  { %v2602_v16 = vpop.f32.mrb[4].mxu1 }
 0x2f1   :  { %v2607_v17 = vsub.f32 %v2602_v16, %v2606_v15  ;;  %v2604_v18 = vpop.f32.mrb[5].mxu1 }
 0x2f3   :  { %v2609_v19 = vadd.f32 1e-05, %v2607_v17 }
 0x2f5   :  { %3205 = vrsqrt.f32 %v2609_v19 }
 0x2ff   :  { %v3206_v21 = vpop.eup %3205 }
 0x300   :  { %2612 = vrot.lane.b32.xlu0 %v3206_v21, %s3336_s9 }
 0x372   :  { %v2613_v23 = vpop.permute.xlu0 %2612 }
 0x373   :  { %v2615_v24 = vmul.f32 %v2613_v23, %v2608_v22 }
 0x375   :  { %2617 = vrot.lane.b32.xlu1 %v2615_v24, %s3350_s22 }
 0x379   :  { %2627 = vperm.xlu1 %3197, %v2615_v24  }
 0x37d   :  { %2638 = vrot.lane.b32.xlu1 %v2608_v22, %s3336_s9 }
 0x3e7   :  { %v2618_v26 = vpop.permute.xlu1 %2617 }
 0x3e8   :  { %v2620_v27 = vmul.f32 %v2618_v26, %v2597_v13 }
 0x3ea   :  { %2622 = vrot.lane.b32.xlu0 %v2620_v27, %s3334_s8 }
 0x3f8   :  { %v2628_v30 = vpop.permute.xlu1 %2627 }
 0x3f9   :  { %v2630_v31 = vmul.f32 %v2628_v30, %v2597_v13 }
 0x3fc   :  { %v2639_v34 = vpop.permute.xlu1 %2638 }
 0x45c   :  { %v2623_v28 = vpop.permute.xlu0 %2622 }
 0x45d   :  { %v2625_v29 = vsub.f32 %v2608_v22, %v2623_v28 }
 0x45f   :  { %2633 = vperm.xlu0 %3198, %v2625_v29  }
 0x4de   :  { %v2634_v32 = vpop.permute.xlu0 %2633 }
 0x4df   :  { %v2636_v33 = vadd.f32 %v2634_v32, %v2630_v31 }
 0x4e1   :  { %3112 = vmatpush3.msra.mxu1 %v2636_v33 }
 0x4e2   :  { %3114 = vmatmul.mubr.msk.f32.vlgmr.msra.gmra.mrb[6].mxu1 %vm2640_vm11, %v2639_v34  ;;  %3097 = vmatprep.subr.msk.mxu1 %vm2730_vm12, %v3686_v53 }
 0x4e3   :  { %2807 = vmatprep.mubr.f32.mxu1 %v3333_v0  ;;  %3098 = vmatpush1.msk.msra.mxu1 %vm2730_vm12, %v3679_v50 }
 0x4e4   :  { %3105 = vmatprep.subr.msk.mxu1 %vm2730_vm12, %v3716_v2 }
 0x5b5   :  { %v2709_v35 = vpop.f32.mrb[6].mxu1 }
 0x5b6   :  { %v2713_v36 = vsub.f32 0.0, %v2709_v35  ;;  %v3115_v37 = vpop.f32.mrb[7].mxu1 }
 0x5b8   :  { %v2714_v38 = vmul.f32 1.442695, %v2713_v36 }
 0x5ba   :  { %3207 = vpow2.f32 %v2714_v38 }
 0x5c4   :  { %v3208_v39 = vpop.eup %3207 }
 0x5c5   :  { %v2716_v40 = vadd.f32 1.0, %v3208_v39 }
 0x5c7   :  { %3209 = vrcp.f32 %v2716_v40 }
 0x5d1   :  { %v3210_v41 = vpop.eup %3209 }
 0x5d2   :  { %v2719_v42 = vmul.f32 %v3210_v41, %v2628_v30  ;;  %v2720_v44 = vmul.f32 %v3210_v41, %v2634_v32 }
 0x5d4   :  { %v2721_v43 = vmul.f32 256.0, %v2719_v42  ;;  %v2722_v45 = vmul.f32 256.0, %v2720_v44 }
 0x5d6   :  { %3099 = vmatmul.mubr.msk.f32.vlgmr.msra.gmra.mrb[8].mxu1 %vm2723_vm13, %v2721_v43  ;;  %3103 = vmatmul.mubr.msk.f32.vlgmr.msra.gmra.mrb[4].mxu0 %vm2723_vm13, %v2721_v43 }
 0x5d7   :  { %2813 = vmatprep.mubr.f32.mxu1 %v3333_v0  ;;  %2890 = vmatprep.mubr.f32.mxu0 %v3333_v0 }
 0x5d8   :  { %3106 = vmatpush1.msk.msra.mxu1 %vm2730_vm12, %v3708_v62 }
 0x5da   :  { %3100 = vmatmul.mubr.msk.f32.gmra.mrb[10].mxu1 %vm2723_vm13, %v2722_v45  ;;  %3104 = vmatmul.mubr.msk.f32.gmra.mrb[6].mxu0 %vm2723_vm13, %v2722_v45 }
 0x5db   :  { %2961 = vmatprep.mubr.f32.mxu1 %v3333_v0 }
 0x5de   :  { %3107 = vmatmul.mubr.msk.f32.vlgmr.msra.gmra.mrb[12].mxu1 %vm2723_vm13, %v2721_v43 }
 0x5df   :  { %2967 = vmatprep.mubr.f32.mxu1 %v3333_v0 }
 0x5e2   :  { %3108 = vmatmul.mubr.msk.f32.gmra.mrb[14].mxu1 %vm2723_vm13, %v2722_v45 }
 0x6a9   :  { %v2809_v46 = vpop.f32.mrb[8].mxu1  ;;  %v2886_v47 = vpop.f32.mrb[4].mxu0 }
 0x6aa   :  { %v2974_v48 = vmul.f32 %v2809_v46, %v3710_v63  ;;  %v2976_v49 = vmul.f32 %v2886_v47, %v3725_v5  ;;  %v2811_v50 = vpop.f32.mrb[9].mxu1  ;;  %v2888_v51 = vpop.f32.mrb[5].mxu0 }
 0x6ab   :  { %v2975_v52 = vmul.f32 %v2811_v50, %v3712_v1  ;;  %v2977_v53 = vmul.f32 %v2888_v51, %v3728_v6 }
 0x6ad   :  { %v2815_v54 = vpop.f32.mrb[10].mxu1  ;;  %v2892_v55 = vpop.f32.mrb[6].mxu0 }
 0x6ae   :  { %v2980_v56 = vadd.f32 %v2974_v48, %v2815_v54  ;;  %v2982_v57 = vadd.f32 %v2976_v49, %v2892_v55  ;;  %v2817_v58 = vpop.f32.mrb[11].mxu1  ;;  %v2894_v59 = vpop.f32.mrb[7].mxu0 }
 0x6af   :  { %v2981_v0 = vadd.f32 %v2975_v52, %v2817_v58  ;;  %v2983_v60 = vadd.f32 %v2977_v53, %v2894_v59 }
 0x6b0   :  { %v2986_v61 = vmax.f32 %v2980_v56, 0.0  ;;  %v2988_v62 = vmax.f32 %v2982_v57, 0.0 }
 0x6b1   :  { %v2987_v2 = vmax.f32 %v2981_v0, 0.0  ;;  %v2989_v63 = vmax.f32 %v2983_v60, 0.0  ;;  %v2963_v3 = vpop.f32.mrb[12].mxu1 }
 0x6b2   :  { %2992 = vst [vmem:[#allocation10] sm:$0xff] %v2986_v61  ;;  %2994 = vst [vmem:[#allocation10 + $0x10] sm:$0xff] %v2988_v62  ;;  %v2978_v4 = vmul.f32 %v2963_v3, %v3731_v7  ;;  %v2965_v1 = vpop.f32.mrb[13].mxu1 }
 0x6b3   :  { %2993 = vst [vmem:[#allocation10 + $0x8] sm:$0xff] %v2987_v2  ;;  %2995 = vst [vmem:[#allocation10 + $0x18] sm:$0xff] %v2989_v63  ;;  %v2979_v5 = vmul.f32 %v2965_v1, %v3735_v9 }
 0x6b5   :  { %v2969_v6 = vpop.f32.mrb[14].mxu1 }
 0x6b6   :  { %v2984_v8 = vadd.f32 %v2978_v4, %v2969_v6  ;;  %v2971_v10 = vpop.f32.mrb[15].mxu1 }
 0x6b7   :  { %v2985_v11 = vadd.f32 %v2979_v5, %v2971_v10 }
 0x6b8   :  { %v2990_v12 = vmax.f32 %v2984_v8, 0.0 }
 0x6b9   :  { %v2991_v13 = vmax.f32 %v2985_v11, 0.0 }
 0x6ba   :  { %2996 = vst [vmem:[#allocation10 + $0x20] sm:$0xff] %v2990_v12 }
 0x6bb   :  { %2997 = vst [vmem:[#allocation10 + $0x28] sm:$0xff] %v2991_v13 }
 0x6bc   :  { %3310 = shalt.err (!%p3307_p8)
}
 0x6bd   :  { %s3311_s26 = scalar_lea.hbm %s3791_s4, 768 }
 0x6be   :  { %p3312_p9 = scmp.ne.s32.totalorder %s3791_s4, %s3311_s26  ;;  %p3315_p10 = scmp.lt.u32.totalorder %s3311_s26, %s3791_s4 }
 0x6c0   :  { %p3317_p11 = pnand %p3315_p10, %p3312_p9 }
 0x6c2   :  { %3320 = shalt.err (!%p3317_p11)
}
 0x6c3   :  { %3007 = dma.vmem_to_hbm [thread:$0]  %s3005_s0, 768, %s3791_s4, [#allocation4]  }
 0x6c4   :  { %3327 = dma.done.wait [#allocation4], 768  }
 0x6c5   :  { %3328 = vsyncadd [#allocation4], 4294966528 }
 0x6c6   :  { %3011 = vsyncpa [#allocation3], 1 }
 0x6c7   :  { %3012 = vsyncpa [#allocation6], 1 }
 0x6c8   :  { %3013 = vsyncpa [#allocation9], 1 }
 0x6c9   :  { %3014 = vsyncpa [#allocation4], 1 }

</bundles_post_ra>
